<compile_context>
chip_gen: v7x
topology: tpu7x:2x2x1
jax: 0.10.0
libtpu: 0.0.40
codegen_flags: <defaults>
</compile_context>

<pallas_src>
import math

import jax
import jax.numpy as jnp
from jax.experimental import pallas as pl
from jax.experimental.pallas import tpu as pltpu

EPS = 1e-5            # PyTorch BatchNorm2d default eps
NEG = -3.0e38         # acts as -inf for the max-pool padding (ReLU output >= 0)


# ------------------------------ Pallas kernel ------------------------------ #

def _stem_fused_kernel(p_ref, w_ref, b_ref, o_ref, carry_ref):
    """Fused conv1(7x7/s2) + folded-BN + ReLU + maxpool(3x3/s2/p1).

    p_ref:     (1, CR*Wo, K)   im2col patches for CR = 2*TP conv rows; within
                               each conv row the columns are ordered
                               (even cols | odd cols).
    w_ref:     (K, C)          conv weights with the BN scale folded in.
    b_ref:     (1, C)          folded BN bias.
    o_ref:     (1, TP, Qo, C)  pooled output tile (TP pooled rows).
    carry_ref: (Qo, C)  VMEM   column-pooled last conv row of the previous
                               row-tile (the pool's 1-row top halo).
    """
    i = pl.program_id(1)                       # row-tile index (sequential)
    TP, Qo, C = o_ref.shape[1], o_ref.shape[2], o_ref.shape[3]
    CR = 2 * TP
    Wo = p_ref.shape[1] // CR

    # --- conv1 (+ folded bn1) + relu: one MXU matmul over the whole row tile ---
    acc = jnp.dot(p_ref[0], w_ref[...], preferred_element_type=jnp.float32)
    y = jnp.maximum(acc + b_ref[...], 0.0)                     # (CR*Wo, C) f32
    y = y.reshape(CR, Wo, C)                                   # conv rows

    # --- 3x3/s2/p1 max-pool, column direction (columns are (even|odd) split) ---
    even = y[:, :Qo, :]                                        # conv col 2q
    odd = y[:, Qo:, :]                                         # conv col 2q+1
    negc = jnp.full((CR, 1, C), NEG, jnp.float32)
    odd_prev = jnp.concatenate([negc, odd[:, :Qo - 1, :]], axis=1)   # col 2q-1
    cp = jnp.maximum(jnp.maximum(even, odd), odd_prev)         # (CR, Qo, C)

    # --- row direction, with a 1-row halo carried from the previous tile ---
    @pl.when(i == 0)
    def _():                                                    # top pool padding
        carry_ref[...] = jnp.full(carry_ref.shape, NEG, carry_ref.dtype)

    halo = carry_ref[...]                                       # conv row 2*i*TP-1
    negr = jnp.full((1, Qo, C), NEG, jnp.float32)
    v = jnp.concatenate([halo[None], cp, negr], axis=0)         # (CR+2, Qo, C)
    v = v.reshape(TP + 1, 2, Qo, C)                             # major-axis split
    out = jnp.maximum(jnp.maximum(v[:TP, 0], v[:TP, 1]), v[1:, 0])   # (TP, Qo, C)
    o_ref[0] = out.astype(o_ref.dtype)

    # carry the column-pooled last conv row for the next tile's top halo
    carry_ref[...] = cp[CR - 1]


# -------------------------------- Wrapper ----------------------------------- #

def visible_module_forward(x_nchw, conv_w, gamma, beta, run_mean, run_var,
                           *, tp_pool_rows=8, compute_dtype=jnp.bfloat16):
    """Forward of the ResNet-50 stem. x: NCHW, returns NCHW (N, 64, H/4, W/4)."""
    N, Cin, H, W = x_nchw.shape
    Cout, Cin_w, KH, KW = conv_w.shape
    assert Cin_w == Cin
    stride, pad = 2, 3
    # TODO(synk): general H/W would need extra -inf masking of partial pool
    # windows; the stem is only ever used with H, W divisible by 4.
    assert H % 4 == 0 and W % 4 == 0, "fused stem kernel assumes H, W % 4 == 0"

    Ho = (H + 2 * pad - KH) // stride + 1
    Wo = (W + 2 * pad - KW) // stride + 1
    Po = (Ho + 2 - 3) // 2 + 1
    Qo = (Wo + 2 - 3) // 2 + 1
    assert Ho == 2 * Po and Wo == 2 * Qo
    K = Cin * KH * KW

    # ---- fold BatchNorm (inference) into the conv weights / bias ----
    scale = gamma / jnp.sqrt(run_var + EPS)                       # (Cout,)
    bias = beta - run_mean * scale                                # (Cout,)
    w2 = conv_w.transpose(2, 3, 1, 0).reshape(K, Cout)            # (kh,kw,cin) rows
    w2 = (w2 * scale[None, :]).astype(compute_dtype)
    bias2 = bias.reshape(1, Cout).astype(jnp.float32)

    # ---- im2col glue (layout only): NHWC, (kh,kw,cin) flatten order, conv
    # columns pre-split into (even | odd) so the kernel's pool is slice-free ----
    x_nhwc = jnp.transpose(x_nchw, (0, 2, 3, 1))
    xp = jnp.pad(x_nhwc, ((0, 0), (pad, pad), (pad, pad), (0, 0)))

    def _gather(col_off):
        cols = jnp.stack(
            [xp[:, kh::stride, col_off + kw::2 * stride, :][:, :Ho, :Qo, :]
             for kh in range(KH) for kw in range(KW)],
            axis=3)                                               # (N,Ho,Qo,49,Cin)
        return cols.reshape(N, Ho, Qo, K)

    patches = jnp.concatenate([_gather(0), _gather(stride)], axis=2)  # (N,Ho,Wo,K)

    # ---- row-tile sizing: TP pooled rows (= 2*TP conv rows) per grid step ----
    TP = max(1, min(int(tp_pool_rows), Po))
    nRT = pl.cdiv(Po, TP)
    if nRT > 1 and (2 * TP * Wo) % 8 != 0:
        TP, nRT = Po, 1                       # keep the matmul tile sublane-aligned
    CR = 2 * TP
    Ho_pad, Po_pad = CR * nRT, TP * nRT

    if Ho_pad > Ho:
        patches = jnp.pad(patches, ((0, 0), (0, Ho_pad - Ho), (0, 0), (0, 0)))
    patches = patches.reshape(N, Ho_pad * Wo, K).astype(compute_dtype)

    out = pl.pallas_call(
        _stem_fused_kernel,
        out_shape=jax.ShapeDtypeStruct((N, Po_pad, Qo, Cout), jnp.float32),
        grid_spec=pltpu.PrefetchScalarGridSpec(
            num_scalar_prefetch=0,
            grid=(N, nRT),
            in_specs=[
                pl.BlockSpec((1, CR * Wo, K), lambda n, i: (n, i, 0)),   # patches
                pl.BlockSpec((K, Cout), lambda n, i: (0, 0)),            # weights
                pl.BlockSpec((1, Cout), lambda n, i: (0, 0)),            # bias
            ],
            out_specs=pl.BlockSpec((1, TP, Qo, Cout), lambda n, i: (n, i, 0, 0)),
            scratch_shapes=[pltpu.VMEM((Qo, Cout), jnp.float32)],        # row halo
        ),
        compiler_params=pltpu.CompilerParams(
            dimension_semantics=("parallel", "arbitrary")),
    )(patches, w2, bias2)

    out = out[:, :Po]                                   # drop padded pooled rows
    return jnp.transpose(out, (0, 3, 1, 2))             # back to NCHW


# ------------------------------ Reference ----------------------------------- #

def _reference(x, w, gamma, beta, mean, var):
    y = jax.lax.conv_general_dilated(
        x, w, window_strides=(2, 2), padding=((3, 3), (3, 3)),
        dimension_numbers=("NCHW", "OIHW", "NCHW"))
    y = (y - mean[None, :, None, None]) / jnp.sqrt(var[None, :, None, None] + EPS)
    y = y * gamma[None, :, None, None] + beta[None, :, None, None]
    y = jnp.maximum(y, 0.0)
    y = jax.lax.reduce_window(
        y, -jnp.inf, jax.lax.max,
        window_dimensions=(1, 1, 3, 3), window_strides=(1, 1, 2, 2),
        padding=((0, 0), (0, 0), (1, 1), (1, 1)))
    return y


# --------------------------------- Main -------------------------------------- #

if __name__ == "__main__":
    key = jax.random.PRNGKey(0)
    kw_, kg, kb, km, kv, kx = jax.random.split(key, 6)

    # Deterministic synthetic parameters (shapes from the resnet50 stem).
    conv_w = jax.random.normal(kw_, (64, 3, 7, 7), jnp.float32) / math.sqrt(3 * 7 * 7)
    gamma = 1.0 + 0.1 * jax.random.normal(kg, (64,), jnp.float32)
    beta = 0.1 * jax.random.normal(kb, (64,), jnp.float32)
    run_mean = 0.1 * jax.random.normal(km, (64,), jnp.float32)
    run_var = jnp.abs(jax.random.normal(kv, (64,), jnp.float32)) + 0.5

    # Small NCHW input consistent with the module (RGB image).
    x = jax.random.normal(kx, (2, 3, 16, 16), jnp.float32)

    ref = jax.block_until_ready(_reference(x, conv_w, gamma, beta, run_mean, run_var))

    # (a) performance path: bf16 MXU inputs (f32 accumulation). Tolerance is
    #     loosened to cover bf16 quantization of the matmul inputs (K=147,
    #     unit-variance data -> max error ~3e-2).
    out = visible_module_forward(x, conv_w, gamma, beta, run_mean, run_var)
    out = jax.block_until_ready(out)
    assert out.shape == (2, 64, 4, 4), out.shape
    assert jnp.allclose(out, ref, atol=8e-2, rtol=2e-2), \
        float(jnp.max(jnp.abs(out - ref)))

    # (b) exact path: f32 MXU inputs, 2 pooled rows per tile -> exercises the
    #     multi-tile cross-step halo carry at tight tolerance.
    out32 = visible_module_forward(x, conv_w, gamma, beta, run_mean, run_var,
                                   tp_pool_rows=2, compute_dtype=jnp.float32)
    out32 = jax.block_until_ready(out32)
    assert jnp.allclose(out32, ref, atol=1e-4, rtol=1e-4), \
        float(jnp.max(jnp.abs(out32 - ref)))

    print("KERNEL_OK")
</pallas_src>

<mosaic_0001>
module attributes {stable_mosaic.version = 11 : i64} {
  func.func @_stem_fused_kernel(%arg0: i32, %arg1: i32, %arg2: memref<1x64x147xbf16, #tpu.memory_space<vmem>>, %arg3: memref<147x64xbf16, #tpu.memory_space<vmem>>, %arg4: memref<1x64xf32, #tpu.memory_space<vmem>>, %arg5: memref<1x4x4x64xf32, #tpu.memory_space<vmem>>, %arg6: memref<4x64xf32, #tpu.memory_space<vmem>>) attributes {dimension_semantics = [#tpu.dimension_semantics<parallel>, #tpu.dimension_semantics<arbitrary>], iteration_bounds = array<i64: 2, 1>, scalar_prefetch = 0 : i64, scratch_operands = 1 : i64, tpu.core_type = #tpu.core_type<tc>, window_params = [{transform_indices = @transform_0, window_bounds = array<i64: 1, 64, 147>}, {pipeline_mode = #tpu.pipeline_mode<synchronous>, transform_indices = @transform_1, window_bounds = array<i64: 147, 64>}, {pipeline_mode = #tpu.pipeline_mode<synchronous>, transform_indices = @transform_2, window_bounds = array<i64: 1, 64>}, {transform_indices = @transform_3, window_bounds = array<i64: 1, 4, 4, 64>}]} {
    %c0 = arith.constant 0 : index
    %c0_0 = arith.constant 0 : index
    %c0_1 = arith.constant 0 : index
    %0 = vector.load %arg2[%c0, %c0_0, %c0_1] : memref<1x64x147xbf16, #tpu.memory_space<vmem>>, vector<1x64x147xbf16>
    %1 = vector.shape_cast %0 : vector<1x64x147xbf16> to vector<64x147xbf16>
    %c0_2 = arith.constant 0 : index
    %c0_3 = arith.constant 0 : index
    %2 = vector.load %arg3[%c0_2, %c0_3] : memref<147x64xbf16, #tpu.memory_space<vmem>>, vector<147x64xbf16>
    %cst = arith.constant dense<0.000000e+00> : vector<64x64xf32>
    %3 = tpu.matmul %1, %2, %cst {dimension_numbers = #tpu.dot_dimension_numbers<[1], [0], [0], [1], [0, 0, 1, 1], [], []>} : vector<64x147xbf16>, vector<147x64xbf16>, vector<64x64xf32> -> vector<64x64xf32>
    %c0_4 = arith.constant 0 : index
    %c0_5 = arith.constant 0 : index
    %4 = vector.load %arg4[%c0_4, %c0_5] : memref<1x64xf32, #tpu.memory_space<vmem>>, vector<1x64xf32>
    %5 = vector.broadcast %4 : vector<1x64xf32> to vector<64x64xf32>
    %6 = arith.addf %3, %5 : vector<64x64xf32>
    %cst_6 = arith.constant 0.000000e+00 : f32
    %7 = vector.broadcast %cst_6 : f32 to vector<64x64xf32>
    %8 = arith.maximumf %6, %7 : vector<64x64xf32>
    %9 = vector.shape_cast %8 : vector<64x64xf32> to vector<8x8x64xf32>
    %10 = vector.extract_strided_slice %9 {offsets = [0, 0, 0], sizes = [8, 4, 64], strides = [1, 1, 1]} : vector<8x8x64xf32> to vector<8x4x64xf32>
    %11 = vector.extract_strided_slice %9 {offsets = [0, 4, 0], sizes = [8, 4, 64], strides = [1, 1, 1]} : vector<8x8x64xf32> to vector<8x4x64xf32>
    %cst_7 = arith.constant -3.000000e+38 : f32
    %12 = vector.broadcast %cst_7 : f32 to vector<8x1x64xf32>
    %13 = vector.extract_strided_slice %11 {offsets = [0, 0, 0], sizes = [8, 3, 64], strides = [1, 1, 1]} : vector<8x4x64xf32> to vector<8x3x64xf32>
    %14 = tpu.concatenate %12, %13 in 1 : vector<8x1x64xf32>, vector<8x3x64xf32> -> vector<8x4x64xf32>
    %15 = arith.maximumf %10, %11 : vector<8x4x64xf32>
    %16 = arith.maximumf %15, %14 : vector<8x4x64xf32>
    %c0_i32 = arith.constant 0 : i32
    %17 = arith.cmpi eq, %arg1, %c0_i32 : i32
    %18 = arith.extui %17 : i1 to i32
    %c0_i32_8 = arith.constant 0 : i32
    %19 = arith.cmpi ne, %18, %c0_i32_8 : i32
    scf.if %19 {
      %cst_18 = arith.constant -3.000000e+38 : f32
      %39 = vector.broadcast %cst_18 : f32 to vector<4x64xf32>
      %c0_19 = arith.constant 0 : index
      %c0_20 = arith.constant 0 : index
      %40 = vector.load %arg6[%c0_19, %c0_20] : memref<4x64xf32, #tpu.memory_space<vmem>>, vector<4x64xf32>
      tpu.vector_store %arg6[%c0_19, %c0_20], %39 {strides = array<i32>} : memref<4x64xf32, #tpu.memory_space<vmem>>, vector<4x64xf32>,
    } else {
    }
    %c0_9 = arith.constant 0 : index
    %c0_10 = arith.constant 0 : index
    %20 = vector.load %arg6[%c0_9, %c0_10] : memref<4x64xf32, #tpu.memory_space<vmem>>, vector<4x64xf32>
    %cst_11 = arith.constant -3.000000e+38 : f32
    %21 = vector.broadcast %cst_11 : f32 to vector<1x4x64xf32>
    %22 = vector.shape_cast %20 : vector<4x64xf32> to vector<1x4x64xf32>
    %23 = tpu.concatenate %22, %16, %21 in 0 : vector<1x4x64xf32>, vector<8x4x64xf32>, vector<1x4x64xf32> -> vector<10x4x64xf32>
    %24 = vector.shape_cast %23 : vector<10x4x64xf32> to vector<5x2x4x64xf32>
    %25 = vector.extract_strided_slice %24 {offsets = [0, 0, 0, 0], sizes = [4, 1, 4, 64], strides = [1, 1, 1, 1]} : vector<5x2x4x64xf32> to vector<4x1x4x64xf32>
    %26 = vector.shape_cast %25 : vector<4x1x4x64xf32> to vector<4x4x64xf32>
    %27 = vector.extract_strided_slice %24 {offsets = [0, 1, 0, 0], sizes = [4, 1, 4, 64], strides = [1, 1, 1, 1]} : vector<5x2x4x64xf32> to vector<4x1x4x64xf32>
    %28 = vector.shape_cast %27 : vector<4x1x4x64xf32> to vector<4x4x64xf32>
    %29 = arith.maximumf %26, %28 : vector<4x4x64xf32>
    %30 = vector.extract_strided_slice %24 {offsets = [1, 0, 0, 0], sizes = [4, 1, 4, 64], strides = [1, 1, 1, 1]} : vector<5x2x4x64xf32> to vector<4x1x4x64xf32>
    %31 = vector.shape_cast %30 : vector<4x1x4x64xf32> to vector<4x4x64xf32>
    %32 = arith.maximumf %29, %31 : vector<4x4x64xf32>
    %c0_12 = arith.constant 0 : index
    %c0_13 = arith.constant 0 : index
    %c0_14 = arith.constant 0 : index
    %c0_15 = arith.constant 0 : index
    %33 = vector.load %arg5[%c0_12, %c0_13, %c0_14, %c0_15] : memref<1x4x4x64xf32, #tpu.memory_space<vmem>>, vector<1x4x4x64xf32>
    %34 = vector.shape_cast %33 : vector<1x4x4x64xf32> to vector<4x4x64xf32>
    %35 = vector.shape_cast %32 : vector<4x4x64xf32> to vector<1x4x4x64xf32>
    tpu.vector_store %arg5[%c0_12, %c0_13, %c0_14, %c0_15], %35 {strides = array<i32>} : memref<1x4x4x64xf32, #tpu.memory_space<vmem>>, vector<1x4x4x64xf32>,
    %36 = vector.extract_strided_slice %16 {offsets = [7, 0, 0], sizes = [1, 4, 64], strides = [1, 1, 1]} : vector<8x4x64xf32> to vector<1x4x64xf32>
    %37 = vector.shape_cast %36 : vector<1x4x64xf32> to vector<4x64xf32>
    %c0_16 = arith.constant 0 : index
    %c0_17 = arith.constant 0 : index
    %38 = vector.load %arg6[%c0_16, %c0_17] : memref<4x64xf32, #tpu.memory_space<vmem>>, vector<4x64xf32>
    tpu.vector_store %arg6[%c0_16, %c0_17], %37 {strides = array<i32>} : memref<4x64xf32, #tpu.memory_space<vmem>>, vector<4x64xf32>,
    return
  }
  func.func @transform_0(%arg0: i32, %arg1: i32) -> (i32, i32, i32) {
    %c0_i32 = arith.constant 0 : i32
    %c0_i32_0 = arith.constant 0 : i32
    return %arg0, %arg1, %c0_i32 : i32, i32, i32
  }
  func.func @transform_1(%arg0: i32, %arg1: i32) -> (i32, i32) {
    %c0_i32 = arith.constant 0 : i32
    %c0_i32_0 = arith.constant 0 : i32
    %c0_i32_1 = arith.constant 0 : i32
    return %c0_i32, %c0_i32_0 : i32, i32
  }
  func.func @transform_2(%arg0: i32, %arg1: i32) -> (i32, i32) {
    %c0_i32 = arith.constant 0 : i32
    %c0_i32_0 = arith.constant 0 : i32
    %c0_i32_1 = arith.constant 0 : i32
    return %c0_i32, %c0_i32_0 : i32, i32
  }
  func.func @transform_3(%arg0: i32, %arg1: i32) -> (i32, i32, i32, i32) {
    %c0_i32 = arith.constant 0 : i32
    %c0_i32_0 = arith.constant 0 : i32
    %c0_i32_1 = arith.constant 0 : i32
    return %arg0, %arg1, %c0_i32, %c0_i32_0 : i32, i32, i32, i32
  }
}

</mosaic_0001>

<bundles_post_ra>
// kernel: tpu_custom_call.1
= control target key start
LH: loop header
LB: loop body
LE: loop exit
PB: predicated region body
PF: predicated region fallthrough
CT: control target
= control target key end

     0   :  { %8 = vsyncpa [#allocation4], 0  ;;  %s1037_s0 = inlined_call_operand.vmem [shape: bf16[2,64,147], index: 0, kind: input, shape index: {}]   ;;  %s1038_s1 = inlined_call_operand.vmem [shape: bf16[147,64], index: 1, kind: input, shape index: {}]   ;;  %s1039_s2 = inlined_call_operand.vmem [shape: f32[1,64], index: 2, kind: input, shape index: {}]   ;;  %s1040_s3 = inlined_call_operand.hbm [shape: f32[2,4,4,64], index: 3, kind: output, shape index: {}]  }
   0x1   :  { %10 = vsyncpa [#allocation4 + $0x1], 0  ;;  %s853_s12 = smov 0   ;;  %s855_s13 = smov 0  }
   0x2   :  { %s857_s14 = smov 0   ;;  %s859_s15 = smov 0  }
   0x3   :  { %s861_s16 = smov 0   ;;  %s863_s17 = smov 0  }
   0x4 LB: > { %s607_s18 = sadd.s32 4294967295, %s825_s17   ;;  %s608_s19 = sadd.s32 4294967294, %s825_s17   ;;  %s825_s17 = sphi %s863_s17, %s16_s17   ;;  %s821_s16 = sphi %s861_s16, %s1047_s16   ;;  %s817_s15 = sphi %s859_s15, %s1046_s15   ;;  %s813_s14 = sphi %s857_s14, %s1045_s14   ;;  %s809_s13 = sphi %s855_s13, %s1044_s13   ;;  %s805_s12 = sphi %s853_s12, %s1043_s12  }
   0x5   : > { %s28_s20 = sadd.s32 1, %s821_s16  ;;  %s107_s21 = sadd.s32 1, %s813_s14 }
   0x6   : > { %p30_p0 = scmp.ge.s32.totalorder %s28_s20, 2  ;;  %p117_p1 = scmp.ne.s32.totalorder %s813_s14, %s809_s13 }
   0x7   : > { %p118_p2 = scmp.eq.s32.totalorder %s607_s18, 1  ;;  %p123_p3 = scmp.ne.s32.totalorder %s809_s13, %s805_s12 }
   0x8   : > { %s1049_s20 = smov (%p30_p0, %s28_s20), 0  ;;  %p124_p5 = scmp.eq.s32.totalorder %s608_s19, 1 }
   0x9   : > { %p893_p4 = por %p118_p2, %p117_p1  ;;  %s102_s23 = ssub.s32 %s821_s16, %s1049_s20 }
   0xa   : > { %p611_p6 = scmp.ge.s32.totalorder %s825_s17, 1  ;;  %p105_p7 = scmp.eq.s32.totalorder %s102_s23, 0 }
   0xb   : > { %p900_p8 = por %p124_p5, %p123_p3  ;;  %p162_p9 = scmp.lt.s32.totalorder %s825_s17, 3 }
   0xc   : > { %s906_s25 = scalar_select %p105_p7, %s813_s14, %s107_s21  }
   0xd   : > { %p163_p10 = pnand %p611_p6, %p162_p9 }
   0xe   : > { %v725_v0 = vld [vmem:[%s1038_s1] sm:$0xff] (!%p163_p10)   ;;  %v827_v1 = vmov (!%p163_p10), 0   ;;  %v726_v2 = vld [vmem:[%s1038_s1 + $0x8] sm:$0xff] (!%p163_p10)   ;;  %v727_v3 = vld [vmem:[%s1038_s1 + $0x10] sm:$0xff] (!%p163_p10)   ;;  %p192_p11 = scmp.lt.s32.totalorder (!%p163_p10), %s817_s15, 1  ;;  %vm331_vm0 = vcmask (!%p163_p10), 154624  }
   0xf   : > { %166 = sbr.rel (%p163_p10) target bundleno = 307 (0x133), region = 32  ;;  %351 = vmatprep.subr.bf16.mxu0 (!%p163_p10), %v827_v1  ;;  %645 = vmatprep.subr.bf16.mxu1 (!%p163_p10), %v827_v1  ;;  %v728_v4 = vld [vmem:[%s1038_s1 + $0x18] sm:$0xff] (!%p163_p10)   ;;  %v729_v6 = vld [vmem:[%s1038_s1 + $0x20] sm:$0xff] (!%p163_p10)   ;;  %v730_v8 = vld [vmem:[%s1038_s1 + $0x28] sm:$0xff] (!%p163_p10)   ;;  %vm344_vm1 = vcmask (!%p163_p10), 1040384   ;;  %vm345_vm2 = vcmask (!%p163_p10), 1041408  }
  0x10   : > { %352 = vmatpush1.bf16.msra.mxu0 (!%p163_p10), %v725_v0  ;;  %655 = vmatpush1.bf16.msra.mxu1 (!%p163_p10), %v725_v0  ;;  %v731_v9 = vld [vmem:[%s1038_s1 + $0x30] sm:$0xff] (!%p163_p10)   ;;  %v732_v10 = vld [vmem:[%s1038_s1 + $0x38] sm:$0xff] (!%p163_p10)   ;;  %v828_v11 = vmov (!%p163_p10), 65535   ;;  %v733_v13 = vld [vmem:[%s1038_s1 + $0x40] sm:$0xff] (!%p163_p10)   ;;  %vm492_vm3 = vcmask (!%p163_p10), 519168   ;;  %s188_s9 = sand.u32 (!%p163_p10), 1, %s809_s13  }
  0x11   : > { %353 = vmatprep.subr.bf16.mxu0 (!%p163_p10), %v827_v1  ;;  %646 = vmatprep.subr.bf16.mxu1 (!%p163_p10), %v827_v1  ;;  %v346_v12 = vsel (!%p163_p10), %vm344_vm1, 4294967295, %v828_v11  ;;  %v734_v14 = vld [vmem:[%s1038_s1 + $0x48] ss:$0 sps:$4 sm:$0x33] (!%p163_p10)   ;;  %v829_v23 = vmov (!%p163_p10), -3e+38  }
  0x12   : > { %v347_v15 = vsel (!%p163_p10), %vm345_vm2, %v346_v12, 0  ;;  %493 = vst.msk [vmem:[#allocation2] sm:$0xf] (!%p163_p10), %vm492_vm3, %v829_v23  ;;  %v615_v24 = vld [vmem:[%s1039_s2] ss:$0 sm:$0xff] (!%p163_p10)  ;;  %s966_s10 = sshll.u32 (!%p163_p10), %s188_s9, 4 }
  0x13   : > { %v349_v16 = vand.u32 (!%p163_p10), %v734_v14, %v347_v15  ;;  %s644_s18 = sshll.u32 (!%p163_p10), %s817_s15, 8  ;;  %s830_s28 = smov (!%p163_p10), [#allocation3]  }
  0x14   : > { %354 = vmatpush1.bf16.msra.mxu0 (!%p163_p10), %v726_v2  ;;  %656 = vmatpush1.bf16.msra.mxu1 (!%p163_p10), %v726_v2  ;;  %s982_s26 = scalar_lea.hbm (!%p163_p10), %s1040_s3, %s644_s18  ;;  %s751_s29 = sshll.u32 (!%p163_p10), %s830_s28, 4  ;;  %s752_s29 = int_to_ptr.vmem [resolvable:$false] %s751_s29 }
  0x15   : > { %355 = vmatprep.subr.bf16.mxu0 (!%p163_p10), %v827_v1  ;;  %647 = vmatprep.subr.bf16.mxu1 (!%p163_p10), %v827_v1  ;;  %s753_s30 = scalar_lea.vmem (!%p163_p10), %s752_s29, 512 }
  0x16   : > { %s193_s5 = scalar_select %p192_p11, %s817_s15, 1 }
  0x17   : > { %s991_s15 = scalar_lea.sflag [#allocation4], %s188_s9 }
  0x18   : > { %356 = vmatpush1.bf16.msra.mxu0 %v727_v3  ;;  %657 = vmatpush1.bf16.msra.mxu1 %v727_v3  ;;  %s643_s8 = sshll.u32 %s193_s5, 6 }
  0x19   : > { %357 = vmatprep.subr.bf16.mxu0 %v827_v1  ;;  %648 = vmatprep.subr.bf16.mxu1 %v827_v1  ;;  %s925_s11 = scalar_lea.vmem %s1037_s0, %s643_s8  ;;  %v494_v45 = vld [vmem:[#allocation2] sm:$0xf] }
  0x1a   : > { %v737_v5 = vld [vmem:[%s925_s11 + $0x4] ss:$8 sps:$4 sm:$0xff]   ;;  %v735_v17 = vld [vmem:[%s925_s11] ss:$8 sps:$4 sm:$0xff]   ;;  %v741_v19 = vld [vmem:[%s925_s11 + $0x14] ss:$8 sps:$4 sm:$0xff]  }
  0x1b   : > { %v740_v7 = vld [vmem:[%s925_s11 + $0x24] ss:$8 sps:$4 sm:$0xff]   ;;  %634 = vmatprep.mubr.msk.bf16.mxu0 %vm331_vm0, %v737_v5  ;;  %v738_v18 = vld [vmem:[%s925_s11 + $0x20] ss:$8 sps:$4 sm:$0xff]   ;;  %v743_v20 = vld [vmem:[%s925_s11 + $0x34] ss:$8 sps:$4 sm:$0xff]  }
  0x1c   : > { %358 = vmatpush1.bf16.msra.mxu0 %v728_v4  ;;  %658 = vmatpush1.bf16.msra.mxu1 %v728_v4  ;;  %v745_v21 = vld [vmem:[%s925_s11 + $0x10] ss:$8 sps:$4 sm:$0xff]  }
  0x1d   : > { %359 = vmatprep.subr.bf16.mxu0 %v827_v1  ;;  %649 = vmatprep.subr.bf16.mxu1 %v827_v1  ;;  %v746_v22 = vld [vmem:[%s925_s11 + $0x30] ss:$8 sps:$4 sm:$0xff]   ;;  %s190_s11 = scalar_lea.vmem [#allocation3], %s966_s10 }
  0x1e   : > { %636 = vmatprep.mubr.msk.bf16.mxu1 %vm331_vm0, %v740_v7  ;;  %s525_s19 = sshll.u32 %s190_s11, 4  ;;  %s984_s19 = int_to_ptr.vmem [resolvable:$true] %s525_s19 }
  0x1f   : > { %s747_s27 = scalar_lea.vmem %s984_s19, 256  ;;  %p754_p1 = scmp.lt.s32.totalorder %s984_s19, %s752_s29 }
  0x20   : > { %360 = vmatpush1.bf16.msra.mxu0 %v729_v6  ;;  %659 = vmatpush1.bf16.msra.mxu1 %v729_v6  ;;  %p748_p12 = scmp.ne.s32.totalorder %s984_s19, %s747_s27  ;;  %p755_p2 = scmp.lt.s32.totalorder %s753_s30, %s747_s27 }
  0x21   : > { %361 = vmatprep.subr.bf16.mxu0 %v827_v1  ;;  %650 = vmatprep.subr.bf16.mxu1 %v827_v1 }
  0x22   : > { %p749_p13 = pnand %p748_p12, %p893_p4  ;;  %p756_p3 = por %p755_p2, %p754_p1 }
  0x24   : > { %362 = vmatpush1.bf16.msra.mxu0 %v730_v8  ;;  %660 = vmatpush1.bf16.msra.mxu1 %v730_v8  ;;  %p750_p0 = pneg %p749_p13 }
  0x25   : > { %363 = vmatprep.subr.bf16.mxu0 %v827_v1  ;;  %651 = vmatprep.subr.bf16.mxu1 %v827_v1 }
  0x26   : > { %p757_p5 = pnand %p756_p3, %p750_p0 }
  0x28   : > { %364 = vmatpush1.bf16.msra.mxu0 %v731_v9  ;;  %661 = vmatpush1.bf16.msra.mxu1 %v731_v9 }
  0x29   : > { %365 = vmatprep.subr.bf16.mxu0 %v827_v1  ;;  %652 = vmatprep.subr.bf16.mxu1 %v827_v1 }
  0x2c   : > { %366 = vmatpush1.bf16.msra.mxu0 %v732_v10  ;;  %662 = vmatpush1.bf16.msra.mxu1 %v732_v10 }
  0x2d   : > { %367 = vmatprep.subr.bf16.mxu0 %v827_v1  ;;  %653 = vmatprep.subr.bf16.mxu1 %v827_v1 }
  0x30   : > { %368 = vmatpush1.bf16.msra.mxu0 %v733_v13  ;;  %663 = vmatpush1.bf16.msra.mxu1 %v733_v13 }
  0x31   : > { %369 = vmatprep.subr.bf16.mxu0 %v827_v1  ;;  %654 = vmatprep.subr.bf16.mxu1 %v827_v1 }
  0x34   : > { %370 = vmatpush1.bf16.msra.mxu0 %v349_v16  ;;  %664 = vmatpush1.bf16.msra.mxu1 %v349_v16 }
  0x37   : > { %384 = vmatmul.mubr.bf16.vlgmr.msra.gmra.mrb[0].mxu0 %v735_v17  ;;  %400 = vmatmul.mubr.bf16.vlgmr.msra.gmra.mrb[0].mxu1 %v738_v18 }
  0x38   : > { %635 = vmatprep.mubr.msk.bf16.mxu0 %vm331_vm0, %v741_v19  ;;  %637 = vmatprep.mubr.msk.bf16.mxu1 %vm331_vm0, %v743_v20 }
  0x3f   : > { %392 = vmatmul.mubr.bf16.gmra.mrb[4].mxu0 %v745_v21  ;;  %408 = vmatmul.mubr.bf16.gmra.mrb[4].mxu1 %v746_v22 }
 0x10a   : > { %v385_v25 = vpop.f32.mrb[0].mxu0  ;;  %v401_v26 = vpop.f32.mrb[0].mxu1 }
 0x10b   : > { %v386_v27 = vadd.f32 %v615_v24, %v385_v25  ;;  %v402_v28 = vadd.f32 %v615_v24, %v401_v26  ;;  %v387_v29 = vpop.f32.mrb[1].mxu0  ;;  %v403_v30 = vpop.f32.mrb[1].mxu1 }
 0x10c   : > { %v388_v31 = vpop.f32.mrb[2].mxu0  ;;  %v404_v32 = vpop.f32.mrb[2].mxu1 }
 0x10d   : > { %v416_v33 = vmax.f32 %v386_v27, 0.0  ;;  %v389_v34 = vadd.f32 %v615_v24, %v388_v31  ;;  %v405_v35 = vadd.f32 %v615_v24, %v404_v32  ;;  %v390_v36 = vpop.f32.mrb[3].mxu0  ;;  %v406_v37 = vpop.f32.mrb[3].mxu1  ;;  %v420_v38 = vmax.f32 %v402_v28, 0.0 }
 0x10f   : > { %v432_v39 = vrot.slane %v416_v33, 3  ;;  %v456_v40 = vrot.slane %v416_v33, 4  ;;  %v417_v41 = vmax.f32 %v389_v34, 0.0  ;;  %v421_v42 = vmax.f32 %v405_v35, 0.0 }
 0x110   : > { %v460_v46 = vrot.slane %v420_v38, 4  ;;  %v436_v57 = vrot.slane %v420_v38, 3 }
 0x111   : > { %v448_v43 = vsel %vm344_vm1, -3e+38, %v432_v39  ;;  %v472_v44 = vmax.f32 %v416_v33, %v456_v40  ;;  %v433_v47 = vrot.slane %v417_v41, 3  ;;  %v457_v48 = vrot.slane %v417_v41, 4 }
 0x112   : > { %v461_v49 = vrot.slane %v421_v42, 4  ;;  %v393_v50 = vpop.f32.mrb[4].mxu0  ;;  %v409_v51 = vpop.f32.mrb[4].mxu1  ;;  %v437_v60 = vrot.slane %v421_v42, 3  ;;  %v476_v5 = vmax.f32 %v420_v38, %v460_v46  ;;  %v452_v25 = vsel %vm344_vm1, -3e+38, %v436_v57 }
 0x113   : > { %v480_v52 = vmax.f32 %v472_v44, %v448_v43  ;;  %v394_v53 = vadd.f32 %v615_v24, %v393_v50  ;;  %v410_v54 = vadd.f32 %v615_v24, %v409_v51  ;;  %v395_v55 = vpop.f32.mrb[5].mxu0  ;;  %v411_v56 = vpop.f32.mrb[5].mxu1  ;;  %v449_v58 = vsel %vm344_vm1, -3e+38, %v433_v47 }
 0x114   : > { %v473_v59 = vmax.f32 %v417_v41, %v457_v48  ;;  %v396_v61 = vpop.f32.mrb[6].mxu0  ;;  %v412_v62 = vpop.f32.mrb[6].mxu1  ;;  %v477_v7 = vmax.f32 %v421_v42, %v461_v49  ;;  %v453_v14 = vsel %vm344_vm1, -3e+38, %v437_v60  ;;  %v484_v35 = vmax.f32 %v476_v5, %v452_v25 }
 0x115   : > { %v495_v63 = vmax.f32 %v494_v45, %v480_v52  ;;  %v418_v0 = vmax.f32 %v394_v53, 0.0  ;;  %v422_v1 = vmax.f32 %v410_v54, 0.0  ;;  %v397_v2 = vadd.f32 %v615_v24, %v396_v61  ;;  %v398_v3 = vpop.f32.mrb[7].mxu0  ;;  %v414_v4 = vpop.f32.mrb[7].mxu1 }
 0x116   : > { %v481_v6 = vmax.f32 %v473_v59, %v449_v58  ;;  %v413_v8 = vadd.f32 %v615_v24, %v412_v62  ;;  %v485_v26 = vmax.f32 %v477_v7, %v453_v14 }
 0x117   : > { %v434_v9 = vrot.slane %v418_v0, 3  ;;  %v458_v10 = vrot.slane %v418_v0, 4  ;;  %v438_v11 = vrot.slane %v422_v1, 3  ;;  %v462_v12 = vrot.slane %v422_v1, 4 }
 0x118   : > { %v499_v13 = vmax.f32 %v495_v63, %v481_v6  ;;  %v419_v15 = vmax.f32 %v397_v2, 0.0  ;;  %v423_v16 = vmax.f32 %v413_v8, 0.0 }
 0x119   : > { %v450_v17 = vsel %vm344_vm1, -3e+38, %v434_v9  ;;  %v474_v18 = vmax.f32 %v418_v0, %v458_v10  ;;  %v454_v19 = vsel %vm344_vm1, -3e+38, %v438_v11  ;;  %v478_v20 = vmax.f32 %v422_v1, %v462_v12 }
 0x11a   : > { %504 = vst.msk [vmem:[%s190_s11] sm:$0xf] %vm492_vm3, %v499_v13  ;;  %v435_v21 = vrot.slane %v419_v15, 3  ;;  %v459_v22 = vrot.slane %v419_v15, 4  ;;  %v439_v23 = vrot.slane %v423_v16, 3  ;;  %v463_v24 = vrot.slane %v423_v16, 4 }
 0x11b   : > { %v482_v27 = vmax.f32 %v474_v18, %v450_v17  ;;  %v486_v28 = vmax.f32 %v478_v20, %v454_v19 }
 0x11c   : > { %v451_v29 = vsel %vm344_vm1, -3e+38, %v435_v21  ;;  %v475_v30 = vmax.f32 %v419_v15, %v459_v22  ;;  %v455_v31 = vsel %vm344_vm1, -3e+38, %v439_v23  ;;  %v479_v32 = vmax.f32 %v423_v16, %v463_v24 }
 0x11d   : > { %v496_v33 = vmax.f32 %v481_v6, %v482_v27  ;;  %v498_v34 = vmax.f32 %v485_v26, %v486_v28 }
 0x11e   : > { %v483_v36 = vmax.f32 %v475_v30, %v451_v29  ;;  %v487_v37 = vmax.f32 %v479_v32, %v455_v31 }
 0x120   : > { %v497_v38 = vmax.f32 %v483_v36, %v484_v35  ;;  %v500_v39 = vmax.f32 %v496_v33, %v483_v36  ;;  %v502_v40 = vmax.f32 %v498_v34, %v487_v37  ;;  %508 = vst.msk [vmem:[#allocation2] sm:$0xf] %vm492_vm3, %v487_v37 }
 0x122   : > { %v501_v41 = vmax.f32 %v497_v38, %v485_v26  ;;  %505 = vst.msk [vmem:[%s190_s11 + $0x4] sm:$0xf] %vm492_vm3, %v500_v39  ;;  %507 = vst.msk [vmem:[%s190_s11 + $0xc] sm:$0xf] %vm492_vm3, %v502_v40 }
 0x124   : > { %506 = vst.msk [vmem:[%s190_s11 + $0x8] sm:$0xf] %vm492_vm3, %v501_v41 }
 0x125   : > { %760 = shalt.err (!%p757_p5)
}
 0x126   : > { %s761_s4 = scalar_lea.hbm %s982_s26, 256  ;;  %s765_s7 = scalar_lea.hbm %s1040_s3, 512 }
 0x127   : > { %p762_p6 = scmp.ne.s32.totalorder %s982_s26, %s761_s4  ;;  %p766_p10 = scmp.lt.u32.totalorder %s982_s26, %s1040_s3 }
 0x128   : > { %p767_p11 = scmp.lt.u32.totalorder %s765_s7, %s761_s4  ;;  %p769_p13 = scmp.lt.u32.totalorder %s761_s4, %s982_s26 }
 0x129   : > { %p763_p7 = pnand %p762_p6, %p893_p4 }
 0x12a   : > { %p768_p12 = por %p767_p11, %p766_p10 }
 0x12b   : > { %p764_p9 = pneg %p763_p7 }
 0x12c   : > { %p770_p0 = por %p769_p13, %p768_p12 }
 0x12e   : > { %p771_p1 = pnand %p770_p0, %p764_p9 }
 0x130   : > { %774 = shalt.err (!%p771_p1)
}
 0x131   : > { %s831_s10 = smov 64   ;;  %s832_s11 = smov 4  }
 0x132   : > { %665 = dma.vmem_to_hbm [thread:$0]  (%p893_p4), %s984_s19, 256, %s982_s26, %s991_s15, %s831_s10, %s831_s10, %s832_s11  }
 0x133 PF: > { %p671_p2 = scmp.ge.s32.totalorder %s825_s17, 2  ;;  %s540_s18 = sand.u32 1, %s805_s12  }
 0x134   : > { %s541_s21 = scalar_lea.sflag [#allocation4], %s540_s18 }
 0x135   : > { %p668_p3 = pnand %p671_p2, %p900_p8 }
 0x137   : > { %800 = dma.done.wait (!%p668_p3), %s541_s21, 256  }
 0x138   : > { %802 = vsyncadd (!%p668_p3), %s541_s21, 4294967040  ;;  %s16_s17 = sadd.s32 1, %s825_s17   ;;  %s1043_s12 = smov %s809_s13 }
 0x139   : > { %p13_p5 = scmp.ge.s32.totalorder %s16_s17, 4   ;;  %s1044_s13 = smov %s813_s14 }
 0x13a   : > { %s1045_s14 = smov %s906_s25  ;;  %s1046_s15 = smov %s821_s16 }
 0x13b   : > { %s1047_s16 = smov %s1049_s20  ;;  %15 = sbr.rel (!%p13_p5) target bundleno = 4 (0x4), region = 71 }
 0x142   :  { %546 = vsyncpa [#allocation4], 1 }
 0x143   :  { %548 = vsyncpa [#allocation4 + $0x1], 1 }

</bundles_post_ra>
